<compile_context>
chip_gen: v7x
topology: tpu7x:2x2x1
jax: 0.10.0
libtpu: 0.0.40
codegen_flags: <defaults>
</compile_context>

<pallas_src>
import functools

import jax
import jax.numpy as jnp
from jax.experimental import pallas as pl
from jax.experimental.pallas import tpu as pltpu


def _residual_kernel(x_ref,
                     wgp_ref, wgc_ref, bg_ref,   # fused [sig; tanh]: prev-tap W, cur-tap W, bias
                     wo_ref, bo_ref,             # fused [skip; residual] 1x1 W, bias
                     s_ref, out_ref,
                     carry_ref,                  # (C, TT) halo carry; only [:, :dpad] is live
                     *, dilation, c_res, c_skip, dpad):
    t_idx = pl.program_id(1)

    x = x_ref[...]                               # (C, TT): channels on sublanes, time on lanes
    tt = x.shape[1]

    # First time tile of each batch row: causal left padding -> zero halo.
    # Only the lanes that can ever be consumed (< dpad >= dilation) are touched.
    @pl.when(t_idx == 0)
    def _():
        carry_ref[:, :dpad] = jnp.zeros((c_res, dpad), carry_ref.dtype)

    # r[:, t] = x[:, (t - dilation) mod TT].  For t >= dilation this is the
    # in-tile previous tap; its first `dilation` (<= dpad) lanes are exactly the
    # halo the *next* tile needs, so a dpad-wide slice of r is the carry.
    r = pltpu.roll(x, dilation % tt, 1)
    lane = jax.lax.broadcasted_iota(jnp.int32, x.shape, 1)
    # Lanes >= dilation of carry_ref may be stale/uninitialized; the mask gates
    # them (select never reads through to arithmetic), so this is safe.
    x_prev = jnp.where(lane < dilation, carry_ref[...], r)
    carry_ref[:, :dpad] = r[:, :dpad]            # partial (lane-aligned) halo store

    # Dilated causal conv (kernel_size = 2), sigmoid + tanh branches fused:
    # rows [0, C) -> sigmoid branch, rows [C, 2C) -> tanh branch.  f32 accumulate.
    zg = (jnp.dot(wgp_ref[...], x_prev, preferred_element_type=jnp.float32)
          + jnp.dot(wgc_ref[...], x, preferred_element_type=jnp.float32)
          + bg_ref[...])                         # (2C, TT) f32
    u = jax.nn.sigmoid(zg[:c_res]) * jnp.tanh(zg[c_res:])      # gated activation, (C, TT) f32

    # Fused skip / residual 1x1 convs: rows [0, Cs) -> skip, [Cs, Cs+C) -> residual.
    y = (jnp.dot(wo_ref[...], u.astype(wo_ref.dtype),
                 preferred_element_type=jnp.float32)
         + bo_ref[...])                          # (Cs+C, TT) f32
    s_ref[...] = y[:c_skip].astype(s_ref.dtype)
    out_ref[...] = (y[c_skip:] + x.astype(jnp.float32)).astype(out_ref.dtype)


def _vmem_budget_bytes():
    """Generation-aware VMEM budget (v7x has 64 MiB physical, v5e/v6e 128 MiB)."""
    try:
        cap = pltpu.get_tpu_info().vmem_capacity_bytes
    except Exception:  # noqa: BLE001 - be conservative if the query is unavailable
        cap = 64 * 1024 * 1024
    return int(cap * 0.75)


def _tile_footprint_bytes(tt, c_res, c_skip, in_bytes, out_bytes):
    """Rough per-step VMEM footprint: double-buffered I/O tiles + carry + f32 temps."""
    io = 2 * (c_res * tt * in_bytes + (c_skip + c_res) * tt * out_bytes)  # x + (skip,out), 2-deep
    carry = c_res * tt * in_bytes
    temps = (c_res            # x_prev / r
             + 2 * c_res      # zg
             + c_res          # u
             + c_skip + c_res  # y
             ) * tt * 4
    return io + carry + temps


def _choose_time_tile(T, dilation, c_res, c_skip, in_bytes, out_bytes,
                      vmem_budget, max_time_tile):
    """Largest lane-dense (multiple of 128) tile that fits the VMEM budget.

    Prefers a tile that divides T exactly (no wrapper pad); multi-tile
    correctness needs tt >= dilation (a single whole-sequence tile is exempt).
    Returns (tile, pad).
    """
    if T < 128:
        return T, 0
    max_tt = max(128, (max_time_tile // 128) * 128)
    cap = min(max_tt, (T // 128) * 128)

    def fits(tt):
        return _tile_footprint_bytes(tt, c_res, c_skip, in_bytes, out_bytes) <= vmem_budget

    # Pass 1: exact divisors of T (no padding).
    tt = cap
    while tt >= 128:
        if T % tt == 0 and (tt >= dilation or tt == T) and fits(tt):
            return tt, 0
        tt -= 128
    # Pass 2: pad the tail (fallback for awkward T).
    tt = cap
    while tt >= 128:
        if tt >= dilation and fits(tt):
            return tt, (-T) % tt
        tt -= 128
    # Last resort: one tile spanning the whole sequence.
    return T, 0


def causal_dilated_residual(x_bct, params, dilation, *,
                            compute_dtype=None, out_dtype=None,
                            max_time_tile=8192):
    """x_bct: (B, C_res, T) — PyTorch NCL layout.  Returns (skip, out) in the same layout.

    compute_dtype: dtype of x and the conv weights fed to the MXU (e.g.
      jnp.bfloat16 to halve input HBM traffic); accumulation stays f32.
    out_dtype: dtype of the skip/out HBM writes (default: input dtype).
    """
    B, C, T = x_bct.shape
    Cs = params["w_skip"].shape[0]
    compute_dtype = x_bct.dtype if compute_dtype is None else compute_dtype
    out_dtype = x_bct.dtype if out_dtype is None else out_dtype

    in_bytes = jnp.dtype(compute_dtype).itemsize
    out_bytes = jnp.dtype(out_dtype).itemsize
    vmem_budget = _vmem_budget_bytes()

    tt, t_pad = _choose_time_tile(T, dilation, C, Cs, in_bytes, out_bytes,
                                  vmem_budget, max_time_tile)
    num_t = (T + t_pad) // tt
    # Lane-aligned halo width actually consumed by the next tile.
    dpad = min(tt, ((max(dilation, 1) + 127) // 128) * 128)

    x_in = x_bct.astype(compute_dtype)
    if t_pad:
        # Fallback only (costs an extra HBM pass on x); common case is t_pad == 0.
        x_in = jnp.pad(x_in, ((0, 0), (0, 0), (0, t_pad)))

    # Stack branch weights once in the wrapper, kept as (C_out, C_in) so the
    # kernel computes W @ x directly in NCL layout (no transposes anywhere).
    wgp = jnp.concatenate([params["w_sig"][:, :, 0],
                           params["w_tanh"][:, :, 0]], axis=0).astype(compute_dtype)  # (2C, C)
    wgc = jnp.concatenate([params["w_sig"][:, :, 1],
                           params["w_tanh"][:, :, 1]], axis=0).astype(compute_dtype)  # (2C, C)
    bg = jnp.concatenate([params["b_sig"], params["b_tanh"]]).reshape(2 * C, 1).astype(jnp.float32)
    wo = jnp.concatenate([params["w_skip"][:, :, 0],
                          params["w_res"][:, :, 0]], axis=0).astype(compute_dtype)    # (Cs+C, C)
    bo = jnp.concatenate([params["b_skip"], params["b_res"]]).reshape(Cs + C, 1).astype(jnp.float32)

    kernel = functools.partial(_residual_kernel, dilation=dilation,
                               c_res=C, c_skip=Cs, dpad=dpad)

    def const2d(shape):
        return pl.BlockSpec(shape, lambda b, t: (0, 0))        # VMEM-resident weights

    s_full, out_full = pl.pallas_call(
        kernel,
        out_shape=(jax.ShapeDtypeStruct((B, Cs, T + t_pad), out_dtype),
                   jax.ShapeDtypeStruct((B, C, T + t_pad), out_dtype)),
        grid=(B, num_t),
        in_specs=[
            # `None` squeezes the batch dim out of the kernel view.
            pl.BlockSpec((None, C, tt), lambda b, t: (b, 0, t)),            # x
            const2d((2 * C, C)), const2d((2 * C, C)), const2d((2 * C, 1)),  # gated conv (fused)
            const2d((Cs + C, C)), const2d((Cs + C, 1)),                     # skip+res 1x1 (fused)
        ],
        out_specs=(pl.BlockSpec((None, Cs, tt), lambda b, t: (b, 0, t)),
                   pl.BlockSpec((None, C, tt), lambda b, t: (b, 0, t))),
        scratch_shapes=[pltpu.VMEM((C, tt), compute_dtype)],                # halo carry
        compiler_params=pltpu.CompilerParams(
            # Time axis MUST stay innermost + "arbitrary" (sequential): the halo
            # carry relies on it and is reset per batch row at t_idx == 0.
            dimension_semantics=("parallel", "arbitrary"),
            vmem_limit_bytes=vmem_budget,
        ),
    )(x_in, wgp, wgc, bg, wo, bo)

    if t_pad:
        s_full = s_full[:, :, :T]
        out_full = out_full[:, :, :T]
    return s_full, out_full


def _reference_forward(x_bct, params, dilation):
    """Pure-JAX reference matching the PyTorch module semantics (NCL layout)."""
    def causal_conv(x, w, b, d):
        # x: (B, C_in, T), w: (C_out, C_in, 2), b: (C_out,)
        T = x.shape[2]
        xp = jnp.pad(x, ((0, 0), (0, 0), (d, 0)))
        prev = xp[:, :, :T]                        # x[t - d] (zero for t < d)
        z = (jnp.einsum("oc,bct->bot", w[:, :, 0], prev)
             + jnp.einsum("oc,bct->bot", w[:, :, 1], x)
             + b[None, :, None])
        return z

    z_sig = causal_conv(x_bct, params["w_sig"], params["b_sig"], dilation)
    z_tanh = causal_conv(x_bct, params["w_tanh"], params["b_tanh"], dilation)
    u = jax.nn.sigmoid(z_sig) * jnp.tanh(z_tanh)
    s = jnp.einsum("oc,bct->bot", params["w_skip"][:, :, 0], u) + params["b_skip"][None, :, None]
    out = (jnp.einsum("oc,bct->bot", params["w_res"][:, :, 0], u)
           + params["b_res"][None, :, None] + x_bct)
    return s, out


def init_params(key, num_residual_channels, num_skip_channels):
    C, Cs = num_residual_channels, num_skip_channels
    ks = jax.random.split(key, 8)
    scale = 0.1
    return {
        "w_sig": scale * jax.random.normal(ks[0], (C, C, 2), jnp.float32),
        "b_sig": scale * jax.random.normal(ks[1], (C,), jnp.float32),
        "w_tanh": scale * jax.random.normal(ks[2], (C, C, 2), jnp.float32),
        "b_tanh": scale * jax.random.normal(ks[3], (C,), jnp.float32),
        "w_skip": scale * jax.random.normal(ks[4], (Cs, C, 1), jnp.float32),
        "b_skip": scale * jax.random.normal(ks[5], (Cs,), jnp.float32),
        "w_res": scale * jax.random.normal(ks[6], (C, C, 1), jnp.float32),
        "b_res": scale * jax.random.normal(ks[7], (C,), jnp.float32),
    }


if __name__ == "__main__":
    # Small but tiling-exercising shapes.
    B, C_RES, C_SKIP, T = 2, 16, 32, 512

    key = jax.random.PRNGKey(0)
    k_x, k_p = jax.random.split(key)
    x = jax.random.normal(k_x, (B, C_RES, T), jnp.float32)   # PyTorch NCL layout
    params = init_params(k_p, C_RES, C_SKIP)

    # f32 paths: (dilation, max_time_tile) combos exercising
    #   - a single whole-sequence tile (auto-chosen),
    #   - multiple tiles with a partial (dpad < tt) halo store,
    #   - multiple tiles with a large dilation (dpad == tt).
    for dilation, max_tt in ((4, 8192), (4, 256), (100, 128)):
        s, out = causal_dilated_residual(x, params, dilation, max_time_tile=max_tt)
        jax.block_until_ready((s, out))
        s_ref, out_ref = _reference_forward(x, params, dilation)
        assert jnp.allclose(s, s_ref, atol=1e-4, rtol=1e-4), (dilation, max_tt)
        assert jnp.allclose(out, out_ref, atol=1e-4, rtol=1e-4), (dilation, max_tt)

    # bf16 compute path (mem-bound win; f32 accumulation), looser tolerance.
    s, out = causal_dilated_residual(x, params, 4,
                                     compute_dtype=jnp.bfloat16, max_time_tile=256)
    jax.block_until_ready((s, out))
    s_ref, out_ref = _reference_forward(x, params, 4)
    assert jnp.allclose(s, s_ref, atol=5e-2, rtol=5e-2)
    assert jnp.allclose(out, out_ref, atol=5e-2, rtol=5e-2)

    print("KERNEL_OK")
</pallas_src>

<mosaic_0001>
module attributes {stable_mosaic.version = 11 : i64} {
  func.func @_residual_kernel(%arg0: i32, %arg1: i32, %arg2: memref<1x16x512xf32, #tpu.memory_space<vmem>>, %arg3: memref<32x16xf32, #tpu.memory_space<vmem>>, %arg4: memref<32x16xf32, #tpu.memory_space<vmem>>, %arg5: memref<32x1xf32, #tpu.memory_space<vmem>>, %arg6: memref<48x16xf32, #tpu.memory_space<vmem>>, %arg7: memref<48x1xf32, #tpu.memory_space<vmem>>, %arg8: memref<1x32x512xf32, #tpu.memory_space<vmem>>, %arg9: memref<1x16x512xf32, #tpu.memory_space<vmem>>, %arg10: memref<16x512xf32, #tpu.memory_space<vmem>>) attributes {dimension_semantics = [#tpu.dimension_semantics<parallel>, #tpu.dimension_semantics<arbitrary>], iteration_bounds = array<i64: 2, 1>, scalar_prefetch = 0 : i64, scratch_operands = 1 : i64, tpu.core_type = #tpu.core_type<tc>, window_params = [{transform_indices = @transform_0, window_bounds = array<i64: 1, 16, 512>}, {pipeline_mode = #tpu.pipeline_mode<synchronous>, transform_indices = @transform_1, window_bounds = array<i64: 32, 16>}, {pipeline_mode = #tpu.pipeline_mode<synchronous>, transform_indices = @transform_2, window_bounds = array<i64: 32, 16>}, {pipeline_mode = #tpu.pipeline_mode<synchronous>, transform_indices = @transform_3, window_bounds = array<i64: 32, 1>}, {pipeline_mode = #tpu.pipeline_mode<synchronous>, transform_indices = @transform_4, window_bounds = array<i64: 48, 16>}, {pipeline_mode = #tpu.pipeline_mode<synchronous>, transform_indices = @transform_5, window_bounds = array<i64: 48, 1>}, {transform_indices = @transform_6, window_bounds = array<i64: 1, 32, 512>}, {transform_indices = @transform_7, window_bounds = array<i64: 1, 16, 512>}]} {
    %c0 = arith.constant 0 : index
    %c0_0 = arith.constant 0 : index
    %c0_1 = arith.constant 0 : index
    %0 = vector.load %arg2[%c0, %c0_0, %c0_1] : memref<1x16x512xf32, #tpu.memory_space<vmem>>, vector<1x16x512xf32>
    %1 = vector.shape_cast %0 : vector<1x16x512xf32> to vector<16x512xf32>
    %c0_i32 = arith.constant 0 : i32
    %2 = arith.cmpi eq, %arg1, %c0_i32 : i32
    %3 = arith.extui %2 : i1 to i32
    %c0_i32_2 = arith.constant 0 : i32
    %4 = arith.cmpi ne, %3, %c0_i32_2 : i32
    scf.if %4 {
      %cst_27 = arith.constant 0.000000e+00 : f32
      %44 = vector.broadcast %cst_27 : f32 to vector<16x128xf32>
      %c0_28 = arith.constant 0 : index
      %c0_29 = arith.constant 0 : index
      %45 = vector.load %arg10[%c0_28, %c0_29] : memref<16x512xf32, #tpu.memory_space<vmem>>, vector<16x128xf32>
      tpu.vector_store %arg10[%c0_28, %c0_29], %44 {strides = array<i32>} : memref<16x512xf32, #tpu.memory_space<vmem>>, vector<16x128xf32>,
    } else {
    }
    %c4_i32 = arith.constant 4 : i32
    %5 = tpu.dynamic_rotate %1 by %c4_i32 dim 1 : vector<16x512xf32>, i32 -> vector<16x512xf32>
    %6 = tpu.iota {dimensions = array<i32: 1>} : vector<16x512xi32>
    %c4_i32_3 = arith.constant 4 : i32
    %7 = vector.broadcast %c4_i32_3 : i32 to vector<16x512xi32>
    %8 = arith.cmpi slt, %6, %7 : vector<16x512xi32>
    %c0_4 = arith.constant 0 : index
    %c0_5 = arith.constant 0 : index
    %9 = vector.load %arg10[%c0_4, %c0_5] : memref<16x512xf32, #tpu.memory_space<vmem>>, vector<16x512xf32>
    %10 = arith.select %8, %9, %5 : vector<16x512xi1>, vector<16x512xf32>
    %11 = vector.extract_strided_slice %5 {offsets = [0, 0], sizes = [16, 128], strides = [1, 1]} : vector<16x512xf32> to vector<16x128xf32>
    %c0_6 = arith.constant 0 : index
    %c0_7 = arith.constant 0 : index
    %12 = vector.load %arg10[%c0_6, %c0_7] : memref<16x512xf32, #tpu.memory_space<vmem>>, vector<16x128xf32>
    tpu.vector_store %arg10[%c0_6, %c0_7], %11 {strides = array<i32>} : memref<16x512xf32, #tpu.memory_space<vmem>>, vector<16x128xf32>,
    %c0_8 = arith.constant 0 : index
    %c0_9 = arith.constant 0 : index
    %13 = vector.load %arg3[%c0_8, %c0_9] : memref<32x16xf32, #tpu.memory_space<vmem>>, vector<32x16xf32>
    %cst = arith.constant dense<0.000000e+00> : vector<32x512xf32>
    %14 = tpu.matmul %13, %10, %cst {dimension_numbers = #tpu.dot_dimension_numbers<[1], [0], [0], [1], [0, 0, 1, 1], [], []>} : vector<32x16xf32>, vector<16x512xf32>, vector<32x512xf32> -> vector<32x512xf32>
    %c0_10 = arith.constant 0 : index
    %c0_11 = arith.constant 0 : index
    %15 = vector.load %arg4[%c0_10, %c0_11] : memref<32x16xf32, #tpu.memory_space<vmem>>, vector<32x16xf32>
    %cst_12 = arith.constant dense<0.000000e+00> : vector<32x512xf32>
    %16 = tpu.matmul %15, %1, %cst_12 {dimension_numbers = #tpu.dot_dimension_numbers<[1], [0], [0], [1], [0, 0, 1, 1], [], []>} : vector<32x16xf32>, vector<16x512xf32>, vector<32x512xf32> -> vector<32x512xf32>
    %17 = arith.addf %14, %16 : vector<32x512xf32>
    %c0_13 = arith.constant 0 : index
    %c0_14 = arith.constant 0 : index
    %18 = vector.load %arg5[%c0_13, %c0_14] : memref<32x1xf32, #tpu.memory_space<vmem>>, vector<32x1xf32>
    %19 = vector.broadcast %18 : vector<32x1xf32> to vector<32x512xf32>
    %20 = arith.addf %17, %19 : vector<32x512xf32>
    %21 = vector.extract_strided_slice %20 {offsets = [0, 0], sizes = [16, 512], strides = [1, 1]} : vector<32x512xf32> to vector<16x512xf32>
    %22 = arith.negf %21 : vector<16x512xf32>
    %23 = math.exp %22 : vector<16x512xf32>
    %cst_15 = arith.constant 1.000000e+00 : f32
    %24 = vector.broadcast %cst_15 : f32 to vector<16x512xf32>
    %25 = arith.addf %24, %23 : vector<16x512xf32>
    %26 = arith.divf %24, %25 : vector<16x512xf32>
    %27 = vector.extract_strided_slice %20 {offsets = [16, 0], sizes = [16, 512], strides = [1, 1]} : vector<32x512xf32> to vector<16x512xf32>
    %28 = math.tanh %27 : vector<16x512xf32>
    %29 = arith.mulf %26, %28 : vector<16x512xf32>
    %c0_16 = arith.constant 0 : index
    %c0_17 = arith.constant 0 : index
    %30 = vector.load %arg6[%c0_16, %c0_17] : memref<48x16xf32, #tpu.memory_space<vmem>>, vector<48x16xf32>
    %cst_18 = arith.constant dense<0.000000e+00> : vector<48x512xf32>
    %31 = tpu.matmul %30, %29, %cst_18 {dimension_numbers = #tpu.dot_dimension_numbers<[1], [0], [0], [1], [0, 0, 1, 1], [], []>} : vector<48x16xf32>, vector<16x512xf32>, vector<48x512xf32> -> vector<48x512xf32>
    %c0_19 = arith.constant 0 : index
    %c0_20 = arith.constant 0 : index
    %32 = vector.load %arg7[%c0_19, %c0_20] : memref<48x1xf32, #tpu.memory_space<vmem>>, vector<48x1xf32>
    %33 = vector.broadcast %32 : vector<48x1xf32> to vector<48x512xf32>
    %34 = arith.addf %31, %33 : vector<48x512xf32>
    %35 = vector.extract_strided_slice %34 {offsets = [0, 0], sizes = [32, 512], strides = [1, 1]} : vector<48x512xf32> to vector<32x512xf32>
    %c0_21 = arith.constant 0 : index
    %c0_22 = arith.constant 0 : index
    %c0_23 = arith.constant 0 : index
    %36 = vector.load %arg8[%c0_21, %c0_22, %c0_23] : memref<1x32x512xf32, #tpu.memory_space<vmem>>, vector<1x32x512xf32>
    %37 = vector.shape_cast %36 : vector<1x32x512xf32> to vector<32x512xf32>
    %38 = vector.shape_cast %35 : vector<32x512xf32> to vector<1x32x512xf32>
    tpu.vector_store %arg8[%c0_21, %c0_22, %c0_23], %38 {strides = array<i32>} : memref<1x32x512xf32, #tpu.memory_space<vmem>>, vector<1x32x512xf32>,
    %39 = vector.extract_strided_slice %34 {offsets = [32, 0], sizes = [16, 512], strides = [1, 1]} : vector<48x512xf32> to vector<16x512xf32>
    %40 = arith.addf %39, %1 : vector<16x512xf32>
    %c0_24 = arith.constant 0 : index
    %c0_25 = arith.constant 0 : index
    %c0_26 = arith.constant 0 : index
    %41 = vector.load %arg9[%c0_24, %c0_25, %c0_26] : memref<1x16x512xf32, #tpu.memory_space<vmem>>, vector<1x16x512xf32>
    %42 = vector.shape_cast %41 : vector<1x16x512xf32> to vector<16x512xf32>
    %43 = vector.shape_cast %40 : vector<16x512xf32> to vector<1x16x512xf32>
    tpu.vector_store %arg9[%c0_24, %c0_25, %c0_26], %43 {strides = array<i32>} : memref<1x16x512xf32, #tpu.memory_space<vmem>>, vector<1x16x512xf32>,
    return
  }
  func.func @transform_0(%arg0: i32, %arg1: i32) -> (i32, i32, i32) {
    %c0_i32 = arith.constant 0 : i32
    %c0_i32_0 = arith.constant 0 : i32
    return %arg0, %c0_i32, %arg1 : i32, i32, i32
  }
  func.func @transform_1(%arg0: i32, %arg1: i32) -> (i32, i32) {
    %c0_i32 = arith.constant 0 : i32
    %c0_i32_0 = arith.constant 0 : i32
    %c0_i32_1 = arith.constant 0 : i32
    return %c0_i32, %c0_i32_0 : i32, i32
  }
  func.func @transform_2(%arg0: i32, %arg1: i32) -> (i32, i32) {
    %c0_i32 = arith.constant 0 : i32
    %c0_i32_0 = arith.constant 0 : i32
    %c0_i32_1 = arith.constant 0 : i32
    return %c0_i32, %c0_i32_0 : i32, i32
  }
  func.func @transform_3(%arg0: i32, %arg1: i32) -> (i32, i32) {
    %c0_i32 = arith.constant 0 : i32
    %c0_i32_0 = arith.constant 0 : i32
    %c0_i32_1 = arith.constant 0 : i32
    return %c0_i32, %c0_i32_0 : i32, i32
  }
  func.func @transform_4(%arg0: i32, %arg1: i32) -> (i32, i32) {
    %c0_i32 = arith.constant 0 : i32
    %c0_i32_0 = arith.constant 0 : i32
    %c0_i32_1 = arith.constant 0 : i32
    return %c0_i32, %c0_i32_0 : i32, i32
  }
  func.func @transform_5(%arg0: i32, %arg1: i32) -> (i32, i32) {
    %c0_i32 = arith.constant 0 : i32
    %c0_i32_0 = arith.constant 0 : i32
    %c0_i32_1 = arith.constant 0 : i32
    return %c0_i32, %c0_i32_0 : i32, i32
  }
  func.func @transform_6(%arg0: i32, %arg1: i32) -> (i32, i32, i32) {
    %c0_i32 = arith.constant 0 : i32
    %c0_i32_0 = arith.constant 0 : i32
    return %arg0, %c0_i32, %arg1 : i32, i32, i32
  }
  func.func @transform_7(%arg0: i32, %arg1: i32) -> (i32, i32, i32) {
    %c0_i32 = arith.constant 0 : i32
    %c0_i32_0 = arith.constant 0 : i32
    return %arg0, %c0_i32, %arg1 : i32, i32, i32
  }
}

</mosaic_0001>

<bundles_post_ra>
// kernel: tpu_custom_call.1
= control target key start
LH: loop header
LB: loop body
LE: loop exit
PB: predicated region body
PF: predicated region fallthrough
CT: control target
= control target key end

     0   :  { %13 = vsyncpa [#allocation4], 0  ;;  %s2089_s0 = inlined_call_operand.vmem [shape: f32[2,16,512], index: 0, kind: input, shape index: {}]   ;;  %s2090_s1 = inlined_call_operand.vmem [shape: f32[32,16], index: 1, kind: input, shape index: {}]   ;;  %s2091_s2 = inlined_call_operand.vmem [shape: f32[32,16], index: 2, kind: input, shape index: {}]   ;;  %s2092_s3 = inlined_call_operand.vmem [shape: f32[32,1], index: 3, kind: input, shape index: {}]   ;;  %s2093_s4 = inlined_call_operand.vmem [shape: f32[48,16], index: 4, kind: input, shape index: {}]   ;;  %s2094_s5 = inlined_call_operand.vmem [shape: f32[48,1], index: 5, kind: input, shape index: {}]   ;;  %s2095_s6 = inlined_call_operand.hbm [shape: f32[2,32,512], index: 6, kind: output, shape index: {0}]   ;;  %s2096_s7 = inlined_call_operand.hbm [shape: f32[2,16,512], index: 7, kind: output, shape index: {1}]  }
   0x1   :  { %15 = vsyncpa [#allocation4 + $0x1], 0 }
   0x2   :  { %16 = vsyncpa [#allocation6], 0 }
   0x3   :  { %18 = vsyncpa [#allocation6 + $0x1], 0  ;;  %s1722_s24 = smov 0   ;;  %s1724_s25 = smov 0  }
   0x4   :  { %s1726_s26 = smov 0   ;;  %s1728_s27 = smov 0  }
   0x5   :  { %s1730_s28 = smov 0   ;;  %s1732_s29 = smov 0  }
   0x6 LB: > { %s1327_s30 = sadd.s32 4294967295, %s1673_s29   ;;  %s1328_s8 = sadd.s32 4294967294, %s1673_s29   ;;  %s1673_s29 = sphi %s1732_s29, %s24_s29   ;;  %s1669_s28 = sphi %s1730_s28, %s2103_s28   ;;  %s1665_s27 = sphi %s1728_s27, %s2102_s27   ;;  %s1661_s26 = sphi %s1726_s26, %s2101_s26   ;;  %s1657_s25 = sphi %s1724_s25, %s2100_s25   ;;  %s1653_s24 = sphi %s1722_s24, %s2099_s24  }
   0x7   : > { %s36_s9 = sadd.s32 1, %s1669_s28  ;;  %s178_s10 = sadd.s32 1, %s1661_s26 }
   0x8   : > { %p38_p0 = scmp.ge.s32.totalorder %s36_s9, 2  ;;  %p188_p1 = scmp.ne.s32.totalorder %s1661_s26, %s1657_s25 }
   0x9   : > { %p189_p2 = scmp.eq.s32.totalorder %s1327_s30, 1  ;;  %p194_p3 = scmp.ne.s32.totalorder %s1657_s25, %s1653_s24 }
   0xa   : > { %s2105_s9 = smov (%p38_p0, %s36_s9), 0  ;;  %p195_p5 = scmp.eq.s32.totalorder %s1328_s8, 1 }
   0xb   : > { %p1762_p4 = por %p189_p2, %p188_p1  ;;  %s173_s12 = ssub.s32 %s1669_s28, %s2105_s9 }
   0xc   : > { %p1331_p6 = scmp.ge.s32.totalorder %s1673_s29, 1  ;;  %p176_p7 = scmp.eq.s32.totalorder %s173_s12, 0 }
   0xd   : > { %p1769_p8 = por %p195_p5, %p194_p3  ;;  %p269_p9 = scmp.lt.s32.totalorder %s1673_s29, 3 }
   0xe   : > { %s1775_s14 = scalar_select %p176_p7, %s1661_s26, %s178_s10  }
   0xf   : > { %p270_p10 = pnand %p1331_p6, %p269_p9 }
  0x10   : > { %p311_p11 = scmp.lt.s32.totalorder (!%p270_p10), %s1665_s27, 1  ;;  %v1675_v0 = vmov (!%p270_p10), 0.0   ;;  %s1676_s20 = smov (!%p270_p10), 4   ;;  %v391_v17 = vld [vmem:[%s2091_s2] sm:$0xff] (!%p270_p10)  ;;  %vm395_vm0 = vcmask (!%p270_p10), 130048   ;;  %v392_v18 = vld [vmem:[%s2091_s2 + $0x8] sm:$0xff] (!%p270_p10)  ;;  %v352_v32 = vlaneseq (!%p270_p10) }
  0x11   : > { %273 = sbr.rel (%p270_p10) target bundleno = 687 (0x2af), region = 44  ;;  %472 = vmatprep.mubr.f32.mxu0 (!%p270_p10), %v1675_v0  ;;  %561 = vmatprep.mubr.f32.mxu1 (!%p270_p10), %v1675_v0  ;;  %v393_v19 = vld [vmem:[%s2091_s2 + $0x10] sm:$0xff] (!%p270_p10)  ;;  %v394_v20 = vld [vmem:[%s2091_s2 + $0x18] sm:$0xff] (!%p270_p10)  ;;  %v777_v21 = vld [vmem:[%s2092_s3 + $0x8] sm:$0xff] (!%p270_p10)  ;;  %v1677_v23 = vmov (!%p270_p10), 0   ;;  %s1954_s17 = sand.u32 (!%p270_p10), 1, %s1657_s25  }
  0x12   : > { %v776_v22 = vld [vmem:[%s2092_s3] sm:$0xff] (!%p270_p10)  ;;  %1514 = vset.pattern.permute.xlu1 (!%p270_p10), %v1677_v23  ;;  %1513 = vset.pattern.permute.xlu0 (!%p270_p10), %v1677_v23  ;;  %v778_v24 = vld [vmem:[%s2092_s3 + $0x10] sm:$0xff] (!%p270_p10)  ;;  %v779_v25 = vld [vmem:[%s2092_s3 + $0x18] sm:$0xff] (!%p270_p10)  ;;  %v353_v34 = vand.u32 (!%p270_p10), 127, %v352_v32  ;;  %s1332_s18 = sshll.u32 (!%p270_p10), %s1954_s17, 7  ;;  %s1333_s22 = sshll.u32 (!%p270_p10), %s1954_s17, 6 }
  0x13   : > { %v890_v26 = vld [vmem:[%s2094_s5 + $0x20] sm:$0xff] (!%p270_p10)  ;;  %v891_v27 = vld [vmem:[%s2094_s5 + $0x28] sm:$0xff] (!%p270_p10)  ;;  %v888_v30 = vld [vmem:[%s2094_s5 + $0x10] sm:$0xff] (!%p270_p10)  ;;  %s1175_s10 = scalar_lea.sflag (!%p270_p10), [#allocation4], %s1954_s17 }
  0x14   : > { %v886_v28 = vld [vmem:[%s2094_s5] sm:$0xff] (!%p270_p10)  ;;  %v887_v29 = vld [vmem:[%s2094_s5 + $0x8] sm:$0xff] (!%p270_p10)  ;;  %v889_v31 = vld [vmem:[%s2094_s5 + $0x18] sm:$0xff] (!%p270_p10)  ;;  %vm354_vm1 = vcmp.lt.s32.totalorder (!%p270_p10), %v353_v34, 4 }
  0x15   : > { %vm1383_vm2 = vmneg (!%p270_p10), %vm354_vm1  ;;  %v387_v58 = vld [vmem:[%s2090_s1] sm:$0xff] (!%p270_p10)  ;;  %v388_v59 = vld [vmem:[%s2090_s1 + $0x8] sm:$0xff] (!%p270_p10) }
  0x16   : > { %vm1398_vm3 = vmpackc.low (!%p270_p10), %vm1383_vm2, %vm1383_vm2  ;;  %v389_v60 = vld [vmem:[%s2090_s1 + $0x10] sm:$0xff] (!%p270_p10)  ;;  %v390_v61 = vld [vmem:[%s2090_s1 + $0x18] sm:$0xff] (!%p270_p10) }
  0x18   : > { %s312_s15 = scalar_select %p311_p11, %s1665_s27, 1 }
  0x1a   : > { %s1380_s16 = sshll.u32 %s312_s15, 6  ;;  %s1678_s15 = smov [#allocation3]  }
  0x1b   : > { %s318_s19 = scalar_lea.vmem %s2089_s0, %s1380_s16  ;;  %s1567_s16 = sshll.u32 %s1678_s15, 4  ;;  %s1568_s16 = int_to_ptr.vmem [resolvable:$false] %s1567_s16 }
  0x1c   : > { %v1784_v1 = vld [vmem:[%s318_s19 + $0x10] sm:$0xff]  ;;  %v1788_v3 = vld [vmem:[%s318_s19] sm:$0xff]  ;;  %v1794_v6 = vld [vmem:[%s318_s19 + $0x18] sm:$0xff] }
  0x1d   : > { %v1786_v2 = vld [vmem:[%s318_s19 + $0x30] sm:$0xff]  ;;  %v1792_v5 = vld [vmem:[%s318_s19 + $0x20] sm:$0xff]  ;;  %v1796_v7 = vld [vmem:[%s318_s19 + $0x38] sm:$0xff] }
  0x1e   : > { %v1503_v4 = vpack.i.bf16 %v1786_v2, %v1784_v1  ;;  %v1393_v8 = vpack.c.bf16 %v1786_v2, %v1784_v1  ;;  %v1493_v9 = vpack.i.bf16 %v1792_v5, %v1788_v3  ;;  %v1802_v10 = vld [vmem:[%s318_s19 + $0x8] sm:$0xff]  ;;  %v1391_v12 = vpack.c.bf16 %v1796_v7, %v1794_v6 }
  0x1f   : > { %v1804_v11 = vld [vmem:[%s318_s19 + $0x28] sm:$0xff]  ;;  %v1389_v13 = vpack.c.bf16 %v1792_v5, %v1788_v3  ;;  %v1508_v14 = vpack.i.bf16 %v1796_v7, %v1794_v6  ;;  %s1959_s19 = scalar_lea.vmem [#allocation3], %s1332_s18  ;;  %s1569_s18 = scalar_lea.vmem %s1568_s16, 4096 }
  0x20   : > { %1504 = vrot.lane.b32.xlu1 %v1503_v4, %s1676_s20  ;;  %v1387_v15 = vpack.c.bf16 %v1804_v11, %v1802_v10  ;;  %1494 = vrot.lane.b32.xlu0 %v1493_v9, %s1676_s20  ;;  %v1498_v16 = vpack.i.bf16 %v1804_v11, %v1802_v10  ;;  %s1195_s21 = sshll.u32 %s1959_s19, 4  ;;  %s1981_s21 = int_to_ptr.vmem [resolvable:$true] %s1195_s21 }
  0x21   : > { %1392 = vmatprep.subr.bf16.mxu1 %v1391_v12  ;;  %s1563_s12 = scalar_lea.vmem %s1981_s21, 2048  ;;  %p1570_p1 = scmp.lt.s32.totalorder %s1981_s21, %s1568_s16 }
  0x22   : > { %1388 = vmatprep.subr.bf16.mxu0 %v1387_v15  ;;  %1394 = vmatpush1.bf16.msra.mxu1 %v1393_v8  ;;  %p1564_p12 = scmp.ne.s32.totalorder %s1981_s21, %s1563_s12  ;;  %p1571_p2 = scmp.lt.s32.totalorder %s1569_s18, %s1563_s12 }
  0x23   : > { %1390 = vmatpush1.bf16.msra.mxu0 %v1389_v13 }
  0x24   : > { %1509 = vrot.lane.b32.xlu1 %v1508_v14, %s1676_s20  ;;  %1499 = vrot.lane.b32.xlu0 %v1498_v16, %s1676_s20  ;;  %s1381_s20 = sshll.u32 %s1665_s27, 11  ;;  %p1565_p13 = pnand %p1564_p12, %p1762_p4 }
  0x25   : > { %1340 = vmatmul.mubr.msk.f32.vlgmr.msra.gmra.mrb[0].mxu1 %vm395_vm0, %v391_v17  ;;  %s1979_s8 = scalar_lea.hbm %s2095_s6, %s1381_s20  ;;  %p1572_p3 = por %p1571_p2, %p1570_p1 }
  0x26   : > { %1336 = vmatmul.mubr.msk.f32.vlgmr.msra.gmra.mrb[0].mxu0 %vm395_vm0, %v391_v17  ;;  %567 = vmatprep.mubr.f32.mxu1 %v1675_v0  ;;  %p1566_p0 = pneg %p1565_p13 }
  0x27   : > { %478 = vmatprep.mubr.f32.mxu0 %v1675_v0 }
  0x28   : > { %787 = vperm.xlu1 %1514, %v777_v21   ;;  %782 = vperm.xlu0 %1513, %v776_v22   ;;  %p1573_p5 = pnand %p1572_p3, %p1566_p0 }
  0x29   : > { %1341 = vmatmul.mubr.msk.f32.gmra.mrb[2].mxu1 %vm395_vm0, %v392_v18 }
  0x2a   : > { %1337 = vmatmul.mubr.msk.f32.gmra.mrb[2].mxu0 %vm395_vm0, %v392_v18  ;;  %573 = vmatprep.mubr.f32.mxu1 %v1675_v0 }
  0x2b   : > { %484 = vmatprep.mubr.f32.mxu0 %v1675_v0 }
  0x2c   : > { %792 = vperm.xlu1 %1514, %v778_v24   ;;  %797 = vperm.xlu0 %1513, %v779_v25  }
  0x2d   : > { %1342 = vmatmul.mubr.msk.f32.gmra.mrb[4].mxu1 %vm395_vm0, %v393_v19 }
  0x2e   : > { %1338 = vmatmul.mubr.msk.f32.gmra.mrb[4].mxu0 %vm395_vm0, %v393_v19  ;;  %579 = vmatprep.mubr.f32.mxu1 %v1675_v0 }
  0x2f   : > { %490 = vmatprep.mubr.f32.mxu0 %v1675_v0 }
  0x30   : > { %914 = vperm.xlu1 %1514, %v890_v26   ;;  %919 = vperm.xlu0 %1513, %v891_v27  }
  0x31   : > { %1343 = vmatmul.mubr.msk.f32.gmra.mrb[6].mxu1 %vm395_vm0, %v394_v20 }
  0x32   : > { %1339 = vmatmul.mubr.msk.f32.gmra.mrb[6].mxu0 %vm395_vm0, %v394_v20  ;;  %751 = vmatprep.mubr.f32.mxu1 %v1675_v0 }
  0x33   : > { %662 = vmatprep.mubr.f32.mxu0 %v1675_v0 }
  0x34   : > { %894 = vperm.xlu1 %1514, %v886_v28   ;;  %899 = vperm.xlu0 %1513, %v887_v29  }
  0x38   : > { %904 = vperm.xlu1 %1514, %v888_v30   ;;  %909 = vperm.xlu0 %1513, %v889_v31  }
  0x92   : > { %v1505_v33 = vpop.permute.xlu1 %1504  ;;  %v1495_v35 = vpop.permute.xlu0 %1494 }
  0x93   : > { %v1507_v36 = vunpack.i.h.bf16 %v1505_v33  ;;  %v1506_v37 = vunpack.i.l.bf16 %v1505_v33  ;;  %v1497_v39 = vunpack.i.h.bf16 %v1495_v35  ;;  %v1496_v40 = vunpack.i.l.bf16 %v1495_v35 }
  0x96   : > { %v1510_v38 = vpop.permute.xlu1 %1509  ;;  %v1500_v43 = vpop.permute.xlu0 %1499 }
  0x97   : > { %v1512_v41 = vunpack.i.h.bf16 %v1510_v38  ;;  %v1511_v42 = vunpack.i.l.bf16 %v1510_v38  ;;  %v1502_v44 = vunpack.i.h.bf16 %v1500_v43  ;;  %v1501_v45 = vunpack.i.l.bf16 %v1500_v43 }
  0x99   : > { %v361_v46 = vsel %vm354_vm1, %v1511_v42, %v1496_v40  ;;  %v362_v47 = vsel %vm354_vm1, %v1512_v41, %v1497_v39  ;;  %v355_v48 = vsel %vm354_vm1, %v1506_v37, %v1511_v42  ;;  %v356_v49 = vsel %vm354_vm1, %v1507_v36, %v1512_v41 }
  0x9a   : > { %v358_v50 = vsel %vm354_vm1, %v1502_v44, %v1507_v36  ;;  %v357_v51 = vsel %vm354_vm1, %v1501_v45, %v1506_v37  ;;  %v359_v52 = vsel %vm354_vm1, %v1496_v40, %v1501_v45  ;;  %v1397_v53 = vpack.c.bf16 %v362_v47, %v361_v46 }
  0x9b   : > { %v1402_v54 = vpack.c.bf16 %v358_v50, %v357_v51  ;;  %v360_v55 = vsel %vm354_vm1, %v1497_v39, %v1502_v44  ;;  %v1400_v56 = vpack.c.bf16 %v356_v49, %v355_v48 }
  0x9c   : > { %v1395_v57 = vpack.c.bf16 %v360_v55, %v359_v52 }
  0x9d   : > { %1401 = vmatprep.subr.bf16.mxu1 %v1400_v56 }
  0x9e   : > { %1396 = vmatprep.subr.bf16.mxu0 %v1395_v57  ;;  %1403 = vmatpush1.bf16.msra.mxu1 %v1402_v54 }
  0x9f   : > { %1399 = vmatpush1.bf16.msk.msra.mxu0 %vm1398_vm3, %v1397_v53 }
  0xa1   : > { %1348 = vmatmul.mubr.msk.f32.vlgmr.msra.gmra.mrb[0].mxu1 %vm395_vm0, %v387_v58 }
  0xa2   : > { %1344 = vmatmul.mubr.msk.f32.vlgmr.msra.gmra.mrb[0].mxu0 %vm395_vm0, %v387_v58  ;;  %757 = vmatprep.mubr.f32.mxu1 %v1675_v0 }
  0xa3   : > { %668 = vmatprep.mubr.f32.mxu0 %v1675_v0 }
  0xa5   : > { %1349 = vmatmul.mubr.msk.f32.gmra.mrb[2].mxu1 %vm395_vm0, %v388_v59 }
  0xa6   : > { %1345 = vmatmul.mubr.msk.f32.gmra.mrb[2].mxu0 %vm395_vm0, %v388_v59  ;;  %763 = vmatprep.mubr.f32.mxu1 %v1675_v0 }
  0xa7   : > { %674 = vmatprep.mubr.f32.mxu0 %v1675_v0  ;;  %v783_v62 = vpop.permute.xlu0 %782  ;;  %v788_v12 = vpop.permute.xlu1 %787 }
  0xa9   : > { %1350 = vmatmul.mubr.msk.f32.gmra.mrb[4].mxu1 %vm395_vm0, %v389_v60 }
  0xaa   : > { %1346 = vmatmul.mubr.msk.f32.gmra.mrb[4].mxu0 %vm395_vm0, %v389_v60  ;;  %769 = vmatprep.mubr.f32.mxu1 %v1675_v0 }
  0xab   : > { %680 = vmatprep.mubr.f32.mxu0 %v1675_v0  ;;  %v793_v30 = vpop.permute.xlu1 %792  ;;  %v798_v41 = vpop.permute.xlu0 %797 }
  0xad   : > { %1351 = vmatmul.mubr.msk.f32.gmra.mrb[6].mxu1 %vm395_vm0, %v390_v61 }
  0xae   : > { %1347 = vmatmul.mubr.msk.f32.gmra.mrb[6].mxu0 %vm395_vm0, %v390_v61  ;;  %1105 = vmatprep.mubr.f32.mxu1 %v1675_v0 }
  0xaf   : > { %1004 = vmatprep.mubr.f32.mxu0 %v1675_v0 }
 0x174   : > { %v753_v63 = vpop.f32.mrb[0].mxu1 }
 0x175   : > { %v664_v4 = vpop.f32.mrb[0].mxu0  ;;  %v802_v8 = vadd.f32 %v783_v62, %v753_v63  ;;  %v755_v9 = vpop.f32.mrb[1].mxu1 }
 0x176   : > { %v800_v13 = vadd.f32 %v783_v62, %v664_v4  ;;  %v666_v14 = vpop.f32.mrb[1].mxu0  ;;  %v803_v15 = vadd.f32 %v783_v62, %v755_v9 }
 0x177   : > { %v1354_v16 = vmul.f32 -1.442695, %v802_v8  ;;  %v801_v17 = vadd.f32 %v783_v62, %v666_v14 }
 0x178   : > { %v1352_v18 = vmul.f32 -1.442695, %v800_v13  ;;  %v1355_v19 = vmul.f32 -1.442695, %v803_v15  ;;  %v759_v20 = vpop.f32.mrb[2].mxu1 }
 0x179   : > { %1515 = vpow2.f32 %v1354_v16  ;;  %v1353_v21 = vmul.f32 -1.442695, %v801_v17  ;;  %v670_v22 = vpop.f32.mrb[2].mxu0  ;;  %v806_v23 = vadd.f32 %v788_v12, %v759_v20  ;;  %v761_v24 = vpop.f32.mrb[3].mxu1 }
 0x17a   : > { %1517 = vpow2.f32 %v1352_v18  ;;  %v804_v25 = vadd.f32 %v788_v12, %v670_v22  ;;  %v672_v26 = vpop.f32.mrb[3].mxu0  ;;  %v807_v27 = vadd.f32 %v788_v12, %v761_v24 }
 0x17b   : > { %1519 = vpow2.f32 %v1353_v21  ;;  %v1358_v28 = vmul.f32 -1.442695, %v806_v23  ;;  %v805_v29 = vadd.f32 %v788_v12, %v672_v26 }
 0x17c   : > { %1521 = vpow2.f32 %v1355_v19  ;;  %v1356_v31 = vmul.f32 -1.442695, %v804_v25  ;;  %v1359_v32 = vmul.f32 -1.442695, %v807_v27  ;;  %v765_v33 = vpop.f32.mrb[4].mxu1 }
 0x17d   : > { %1523 = vpow2.f32 %v1358_v28  ;;  %v1357_v34 = vmul.f32 -1.442695, %v805_v29  ;;  %v676_v35 = vpop.f32.mrb[4].mxu0  ;;  %v767_v36 = vpop.f32.mrb[5].mxu1  ;;  %v810_v38 = vadd.f32 %v793_v30, %v765_v33 }
 0x17e   : > { %1525 = vpow2.f32 %v1356_v31  ;;  %v808_v37 = vadd.f32 %v793_v30, %v676_v35  ;;  %v678_v39 = vpop.f32.mrb[5].mxu0  ;;  %v811_v42 = vadd.f32 %v793_v30, %v767_v36 }
 0x17f   : > { %1527 = vpow2.f32 %v1357_v34  ;;  %v809_v40 = vadd.f32 %v793_v30, %v678_v39 }
 0x180   : > { %1529 = vpow2.f32 %v1359_v32  ;;  %v771_v43 = vpop.f32.mrb[6].mxu1 }
 0x181   : > { %1531 = vtanh.f32 %v808_v37  ;;  %v682_v44 = vpop.f32.mrb[6].mxu0  ;;  %v773_v45 = vpop.f32.mrb[7].mxu1  ;;  %v814_v63 = vadd.f32 %v798_v41, %v771_v43  ;;  %v883_v43 = vld [vmem:[%s2093_s4 + $0x18] sm:$0xff] }
 0x182   : > { %1533 = vtanh.f32 %v810_v38  ;;  %v812_v46 = vadd.f32 %v798_v41, %v682_v44  ;;  %v684_v47 = vpop.f32.mrb[7].mxu0  ;;  %v815_v13 = vadd.f32 %v798_v41, %v773_v45  ;;  %v884_v44 = vld [vmem:[%s2093_s4 + $0x20] sm:$0xff]  ;;  %v885_v45 = vld [vmem:[%s2093_s4 + $0x28] sm:$0xff] }
 0x183   : > { %v1516_v48 = vpop.eup %1515  ;;  %1535 = vtanh.f32 %v809_v40  ;;  %v813_v9 = vadd.f32 %v798_v41, %v684_v47  ;;  %v880_v40 = vld [vmem:[%s2093_s4] sm:$0xff]  ;;  %v881_v41 = vld [vmem:[%s2093_s4 + $0x8] sm:$0xff]  ;;  %v1957_v47 = vpop.permute.xlu0 %919 }
 0x184   : > { %v1518_v49 = vpop.eup %1517  ;;  %v842_v50 = vadd.f32 1.0, %v1516_v48  ;;  %1537 = vtanh.f32 %v811_v42  ;;  %v882_v42 = vld [vmem:[%s2093_s4 + $0x10] sm:$0xff] }
 0x185   : > { %v1520_v51 = vpop.eup %1519  ;;  %v840_v52 = vadd.f32 1.0, %v1518_v49  ;;  %1539 = vtanh.f32 %v812_v46  ;;  %v1951_v46 = vpop.permute.xlu1 %914 }
 0x186   : > { %v1522_v53 = vpop.eup %1521  ;;  %1541 = vrcp.f32 %v842_v50  ;;  %v841_v54 = vadd.f32 1.0, %v1520_v51 }
 0x187   : > { %v1524_v55 = vpop.eup %1523  ;;  %1543 = vrcp.f32 %v840_v52  ;;  %v843_v56 = vadd.f32 1.0, %v1522_v53 }
 0x188   : > { %v1526_v57 = vpop.eup %1525  ;;  %1545 = vrcp.f32 %v841_v54  ;;  %v846_v58 = vadd.f32 1.0, %v1524_v55 }
 0x189   : > { %v1528_v59 = vpop.eup %1527  ;;  %1547 = vrcp.f32 %v843_v56  ;;  %v844_v60 = vadd.f32 1.0, %v1526_v57  ;;  %v895_v48 = vpop.permute.xlu1 %894 }
 0x18a   : > { %v1530_v61 = vpop.eup %1529  ;;  %1549 = vrcp.f32 %v846_v58  ;;  %v845_v62 = vadd.f32 1.0, %v1528_v59  ;;  %v900_v56 = vpop.permute.xlu0 %899 }
 0x18b   : > { %v1532_v4 = vpop.eup %1531  ;;  %1551 = vrcp.f32 %v844_v60  ;;  %v847_v8 = vadd.f32 1.0, %v1530_v61 }
 0x18c   : > { %v1534_v12 = vpop.eup %1533  ;;  %1553 = vrcp.f32 %v845_v62 }
 0x18d   : > { %v1536_v14 = vpop.eup %1535  ;;  %1555 = vrcp.f32 %v847_v8  ;;  %v905_v8 = vpop.permute.xlu1 %904 }
 0x18e   : > { %v1538_v15 = vpop.eup %1537  ;;  %1557 = vtanh.f32 %v814_v63 }
 0x18f   : > { %v1540_v16 = vpop.eup %1539  ;;  %1559 = vtanh.f32 %v813_v9 }
 0x190   : > { %v1542_v17 = vpop.eup %1541  ;;  %1561 = vtanh.f32 %v815_v13 }
 0x191   : > { %v1544_v18 = vpop.eup %1543  ;;  %v874_v19 = vmul.f32 %v1542_v17, %v1534_v12 }
 0x192   : > { %v1546_v20 = vpop.eup %1545  ;;  %v872_v21 = vmul.f32 %v1544_v18, %v1532_v4 }
 0x193   : > { %v1548_v22 = vpop.eup %1547  ;;  %v873_v23 = vmul.f32 %v1546_v20, %v1536_v14 }
 0x194   : > { %v1550_v24 = vpop.eup %1549  ;;  %v875_v25 = vmul.f32 %v1548_v22, %v1538_v15 }
 0x195   : > { %v1552_v26 = vpop.eup %1551 }
 0x196   : > { %v1554_v27 = vpop.eup %1553  ;;  %v876_v28 = vmul.f32 %v1552_v26, %v1540_v16 }
 0x197   : > { %v1556_v29 = vpop.eup %1555 }
 0x198   : > { %v1558_v30 = vpop.eup %1557  ;;  %v1406_v31 = vpack.c.bf16 %v876_v28, %v872_v21 }
 0x199   : > { %v1560_v32 = vpop.eup %1559  ;;  %v878_v33 = vmul.f32 %v1558_v30, %v1550_v24 }
 0x19a   : > { %v1562_v34 = vpop.eup %1561  ;;  %v877_v35 = vmul.f32 %v1560_v32, %v1554_v27 }
 0x19b   : > { %v879_v36 = vmul.f32 %v1562_v34, %v1556_v29  ;;  %v1410_v37 = vpack.c.bf16 %v878_v33, %v874_v19  ;;  %v910_v19 = vpop.permute.xlu0 %909 }
 0x19c   : > { %v1404_v38 = vpack.c.bf16 %v877_v35, %v873_v23 }
 0x19d   : > { %v1408_v39 = vpack.c.bf16 %v879_v36, %v875_v25 }
 0x19e   : > { %1405 = vmatprep.subr.bf16.mxu0 %v1404_v38 }
 0x19f   : > { %1409 = vmatprep.subr.bf16.mxu1 %v1408_v39  ;;  %1407 = vmatpush1.bf16.msra.mxu0 %v1406_v31 }
 0x1a0   : > { %1411 = vmatpush1.bf16.msra.mxu1 %v1410_v37 }
 0x1a2   : > { %1360 = vmatmul.mubr.msk.f32.vlgmr.msra.gmra.mrb[8].mxu0 %vm395_vm0, %v880_v40 }
 0x1a3   : > { %1366 = vmatmul.mubr.msk.f32.vlgmr.msra.gmra.mrb[8].mxu1 %vm395_vm0, %v880_v40  ;;  %1010 = vmatprep.mubr.f32.mxu0 %v1675_v0 }
 0x1a4   : > { %1111 = vmatprep.mubr.f32.mxu1 %v1675_v0 }
 0x1a6   : > { %1361 = vmatmul.mubr.msk.f32.gmra.mrb[10].mxu0 %vm395_vm0, %v881_v41 }
 0x1a7   : > { %1367 = vmatmul.mubr.msk.f32.gmra.mrb[10].mxu1 %vm395_vm0, %v881_v41  ;;  %1016 = vmatprep.mubr.f32.mxu0 %v1675_v0 }
 0x1a8   : > { %1117 = vmatprep.mubr.f32.mxu1 %v1675_v0 }
 0x1aa   : > { %1362 = vmatmul.mubr.msk.f32.gmra.mrb[12].mxu0 %vm395_vm0, %v882_v42 }
 0x1ab   : > { %1368 = vmatmul.mubr.msk.f32.gmra.mrb[12].mxu1 %vm395_vm0, %v882_v42  ;;  %1022 = vmatprep.mubr.f32.mxu0 %v1675_v0 }
 0x1ac   : > { %1123 = vmatprep.mubr.f32.mxu1 %v1675_v0 }
 0x1ae   : > { %1363 = vmatmul.mubr.msk.f32.gmra.mrb[14].mxu0 %vm395_vm0, %v883_v43 }
 0x1af   : > { %1369 = vmatmul.mubr.msk.f32.gmra.mrb[14].mxu1 %vm395_vm0, %v883_v43  ;;  %1028 = vmatprep.mubr.f32.mxu0 %v1675_v0 }
 0x1b0   : > { %1129 = vmatprep.mubr.f32.mxu1 %v1675_v0 }
 0x1b2   : > { %1364 = vmatmul.mubr.msk.f32.gmra.mrb[16].mxu0 %vm395_vm0, %v884_v44 }
 0x1b3   : > { %1370 = vmatmul.mubr.msk.f32.gmra.mrb[16].mxu1 %vm395_vm0, %v884_v44  ;;  %1034 = vmatprep.mubr.f32.mxu0 %v1675_v0 }
 0x1b4   : > { %1135 = vmatprep.mubr.f32.mxu1 %v1675_v0 }
 0x1b6   : > { %1365 = vmatmul.mubr.msk.f32.gmra.mrb[18].mxu0 %vm395_vm0, %v885_v45 }
 0x1b7   : > { %1371 = vmatmul.mubr.msk.f32.gmra.mrb[18].mxu1 %vm395_vm0, %v885_v45 }
 0x275   : > { %v1006_v49 = vpop.f32.mrb[8].mxu0 }
 0x276   : > { %v1007_v50 = vadd.f32 %v1006_v49, %v895_v48  ;;  %v1107_v51 = vpop.f32.mrb[8].mxu1  ;;  %v1008_v52 = vpop.f32.mrb[9].mxu0 }
 0x277   : > { %v1108_v53 = vadd.f32 %v1107_v51, %v895_v48  ;;  %v1009_v54 = vadd.f32 %v1008_v52, %v895_v48  ;;  %v1109_v0 = vpop.f32.mrb[9].mxu1 }
 0x278   : > { %1142 = vst [vmem:[%s1959_s19] sm:$0xff] %v1007_v50  ;;  %v1110_v55 = vadd.f32 %v1109_v0, %v895_v48 }
 0x279   : > { %1144 = vst [vmem:[%s1959_s19 + $0x10] sm:$0xff] %v1108_v53  ;;  %1143 = vst [vmem:[%s1959_s19 + $0x8] sm:$0xff] %v1009_v54  ;;  %v1012_v57 = vpop.f32.mrb[10].mxu0 }
 0x27a   : > { %1145 = vst [vmem:[%s1959_s19 + $0x18] sm:$0xff] %v1110_v55  ;;  %v1013_v58 = vadd.f32 %v1012_v57, %v900_v56  ;;  %v1113_v59 = vpop.f32.mrb[10].mxu1  ;;  %v1014_v60 = vpop.f32.mrb[11].mxu0 }
 0x27b   : > { %v1114_v61 = vadd.f32 %v1113_v59, %v900_v56  ;;  %v1015_v62 = vadd.f32 %v1014_v60, %v900_v56  ;;  %v1115_v63 = vpop.f32.mrb[11].mxu1 }
 0x27c   : > { %1146 = vst [vmem:[%s1959_s19 + $0x20] sm:$0xff] %v1013_v58  ;;  %v1116_v4 = vadd.f32 %v1115_v63, %v900_v56 }
 0x27d   : > { %1148 = vst [vmem:[%s1959_s19 + $0x30] sm:$0xff] %v1114_v61  ;;  %1147 = vst [vmem:[%s1959_s19 + $0x28] sm:$0xff] %v1015_v62  ;;  %v1018_v9 = vpop.f32.mrb[12].mxu0 }
 0x27e   : > { %1149 = vst [vmem:[%s1959_s19 + $0x38] sm:$0xff] %v1116_v4  ;;  %v1019_v12 = vadd.f32 %v1018_v9, %v905_v8  ;;  %v1119_v13 = vpop.f32.mrb[12].mxu1  ;;  %v1020_v14 = vpop.f32.mrb[13].mxu0 }
 0x27f   : > { %v1120_v15 = vadd.f32 %v1119_v13, %v905_v8  ;;  %v1021_v16 = vadd.f32 %v1020_v14, %v905_v8  ;;  %v1121_v17 = vpop.f32.mrb[13].mxu1 }
 0x280   : > { %1150 = vst [vmem:[%s1959_s19 + $0x40] sm:$0xff] %v1019_v12  ;;  %v1122_v18 = vadd.f32 %v1121_v17, %v905_v8 }
 0x281   : > { %1152 = vst [vmem:[%s1959_s19 + $0x50] sm:$0xff] %v1120_v15  ;;  %1151 = vst [vmem:[%s1959_s19 + $0x48] sm:$0xff] %v1021_v16  ;;  %v1024_v20 = vpop.f32.mrb[14].mxu0 }
 0x282   : > { %1153 = vst [vmem:[%s1959_s19 + $0x58] sm:$0xff] %v1122_v18  ;;  %v1025_v21 = vadd.f32 %v1024_v20, %v910_v19  ;;  %v1125_v22 = vpop.f32.mrb[14].mxu1  ;;  %v1026_v23 = vpop.f32.mrb[15].mxu0 }
 0x283   : > { %v1126_v24 = vadd.f32 %v1125_v22, %v910_v19  ;;  %v1027_v25 = vadd.f32 %v1026_v23, %v910_v19  ;;  %v1127_v26 = vpop.f32.mrb[15].mxu1 }
 0x284   : > { %1154 = vst [vmem:[%s1959_s19 + $0x60] sm:$0xff] %v1025_v21  ;;  %v1128_v27 = vadd.f32 %v1127_v26, %v910_v19 }
 0x285   : > { %1156 = vst [vmem:[%s1959_s19 + $0x70] sm:$0xff] %v1126_v24  ;;  %1155 = vst [vmem:[%s1959_s19 + $0x68] sm:$0xff] %v1027_v25  ;;  %v1030_v28 = vpop.f32.mrb[16].mxu0 }
 0x286   : > { %1157 = vst [vmem:[%s1959_s19 + $0x78] sm:$0xff] %v1128_v27  ;;  %v1031_v29 = vadd.f32 %v1030_v28, %v1951_v46  ;;  %v1131_v30 = vpop.f32.mrb[16].mxu1  ;;  %v1032_v31 = vpop.f32.mrb[17].mxu0 }
 0x287   : > { %v1132_v32 = vadd.f32 %v1131_v30, %v1951_v46  ;;  %v1033_v33 = vadd.f32 %v1032_v31, %v1951_v46  ;;  %v1133_v34 = vpop.f32.mrb[17].mxu1 }
 0x288   : > { %1576 = shalt.err (!%p1573_p5)
}
 0x289   : > { %s1577_s19 = scalar_lea.hbm %s1979_s8, 2048  ;;  %s1581_s30 = scalar_lea.hbm %s2095_s6, 4096 }
 0x28a   : > { %p1578_p6 = scmp.ne.s32.totalorder %s1979_s8, %s1577_s19  ;;  %p1582_p10 = scmp.lt.u32.totalorder %s1979_s8, %s2095_s6 }
 0x28b   : > { %p1583_p11 = scmp.lt.u32.totalorder %s1581_s30, %s1577_s19  ;;  %p1585_p13 = scmp.lt.u32.totalorder %s1577_s19, %s1979_s8 }
 0x28c   : > { %p1579_p7 = pnand %p1578_p6, %p1762_p4 }
 0x28d   : > { %p1584_p12 = por %p1583_p11, %p1582_p10 }
 0x28e   : > { %p1580_p9 = pneg %p1579_p7 }
 0x28f   : > { %p1586_p0 = por %p1585_p13, %p1584_p12 }
 0x291   : > { %p1587_p1 = pnand %p1586_p0, %p1580_p9 }
 0x293   : > { %1590 = shalt.err (!%p1587_p1)
}
 0x294   : > { %s1679_s12 = smov 512   ;;  %s1680_s18 = smov 32   ;;  %v1158_v35 = vadd.f32 %v1031_v29, %v1788_v3  ;;  %v1134_v36 = vadd.f32 %v1133_v34, %v1951_v46  ;;  %v1160_v37 = vadd.f32 %v1132_v32, %v1784_v1  ;;  %v1159_v38 = vadd.f32 %v1033_v33, %v1802_v10  ;;  %v1036_v39 = vpop.f32.mrb[18].mxu0  ;;  %v1137_v42 = vpop.f32.mrb[18].mxu1 }
 0x295   : > { %1428 = dma.vmem_to_hbm [thread:$0]  (%p1762_p4), %s1981_s21, 2048, %s1979_s8, %s1175_s10, %s1679_s12, %s1679_s12, %s1680_s18   ;;  %v1037_v41 = vadd.f32 %v1036_v39, %v1957_v47  ;;  %v1038_v43 = vpop.f32.mrb[19].mxu0  ;;  %v1138_v3 = vadd.f32 %v1137_v42, %v1957_v47  ;;  %v1139_v1 = vpop.f32.mrb[19].mxu1 }
 0x296   : > { %s309_s19 = scalar_lea.vmem [#allocation5], %s1333_s22  ;;  %v1161_v40 = vadd.f32 %v1134_v36, %v1794_v6  ;;  %v1039_v44 = vadd.f32 %v1038_v43, %v1957_v47  ;;  %s1382_s21 = sshll.u32 %s1665_s27, 10  ;;  %v1140_v6 = vadd.f32 %v1139_v1, %v1957_v47 }
 0x297   : > { %1166 = vst [vmem:[%s309_s19] sm:$0xff] %v1158_v35  ;;  %1168 = vst [vmem:[%s309_s19 + $0x10] sm:$0xff] %v1160_v37  ;;  %s1213_s8 = sshll.u32 %s309_s19, 4  ;;  %v1162_v10 = vadd.f32 %v1037_v41, %v1792_v5  ;;  %v1164_v45 = vadd.f32 %v1138_v3, %v1786_v2  ;;  %s2036_s20 = scalar_lea.hbm %s2096_s7, %s1382_s21  ;;  %s2038_s8 = int_to_ptr.vmem [resolvable:$true] %s1213_s8 }
 0x298   : > { %1167 = vst [vmem:[%s309_s19 + $0x8] sm:$0xff] %v1159_v38  ;;  %1169 = vst [vmem:[%s309_s19 + $0x18] sm:$0xff] %v1161_v40  ;;  %v1163_v46 = vadd.f32 %v1039_v44, %v1804_v11  ;;  %v1165_v48 = vadd.f32 %v1140_v6, %v1796_v7  ;;  %s1180_s27 = scalar_lea.sflag [#allocation6], %s1954_s17  ;;  %s1591_s23 = scalar_lea.vmem %s2038_s8, 1024 }
 0x299   : > { %1170 = vst [vmem:[%s309_s19 + $0x20] sm:$0xff] %v1162_v10  ;;  %1172 = vst [vmem:[%s309_s19 + $0x30] sm:$0xff] %v1164_v45  ;;  %p1592_p2 = scmp.ne.s32.totalorder %s2038_s8, %s1591_s23  ;;  %s1681_s30 = smov [#allocation5]  }
 0x29a   : > { %1171 = vst [vmem:[%s309_s19 + $0x28] sm:$0xff] %v1163_v46  ;;  %1173 = vst [vmem:[%s309_s19 + $0x38] sm:$0xff] %v1165_v48  ;;  %s1595_s15 = sshll.u32 %s1681_s30, 4  ;;  %s1596_s15 = int_to_ptr.vmem [resolvable:$false] %s1595_s15 }
 0x29b   : > { %p1593_p3 = pnand %p1592_p2, %p1762_p4  ;;  %s1597_s16 = scalar_lea.vmem %s1596_s15, 2048 }
 0x29c   : > { %p1598_p6 = scmp.lt.s32.totalorder %s2038_s8, %s1596_s15  ;;  %p1599_p7 = scmp.lt.s32.totalorder %s1597_s16, %s1591_s23 }
 0x29d   : > { %p1594_p5 = pneg %p1593_p3 }
 0x29e   : > { %p1600_p9 = por %p1599_p7, %p1598_p6 }
 0x2a0   : > { %p1601_p10 = pnand %p1600_p9, %p1594_p5 }
 0x2a2   : > { %1604 = shalt.err (!%p1601_p10)
}
 0x2a3   : > { %s1605_s19 = scalar_lea.hbm %s2036_s20, 1024  ;;  %s1609_s10 = scalar_lea.hbm %s2096_s7, 2048 }
 0x2a4   : > { %p1606_p11 = scmp.ne.s32.totalorder %s2036_s20, %s1605_s19  ;;  %p1610_p0 = scmp.lt.u32.totalorder %s2036_s20, %s2096_s7 }
 0x2a5   : > { %p1611_p1 = scmp.lt.u32.totalorder %s1609_s10, %s1605_s19  ;;  %p1613_p3 = scmp.lt.u32.totalorder %s1605_s19, %s2036_s20 }
 0x2a6   : > { %p1607_p12 = pnand %p1606_p11, %p1762_p4 }
 0x2a7   : > { %p1612_p2 = por %p1611_p1, %p1610_p0 }
 0x2a8   : > { %p1608_p13 = pneg %p1607_p12 }
 0x2a9   : > { %p1614_p5 = por %p1613_p3, %p1612_p2 }
 0x2ab   : > { %p1615_p6 = pnand %p1614_p5, %p1608_p13 }
 0x2ad   : > { %1618 = shalt.err (!%p1615_p6)
}
 0x2ae   : > { %1429 = dma.vmem_to_hbm [thread:$0]  (%p1762_p4), %s2038_s8, 1024, %s2036_s20, %s1180_s27, %s1679_s12, %s1679_s12, %s1680_s18  }
 0x2af PF: > { %p1439_p7 = scmp.ge.s32.totalorder %s1673_s29, 2  ;;  %s1228_s23 = sand.u32 1, %s1653_s24  }
 0x2b0   : > { %s1229_s16 = scalar_lea.sflag [#allocation4], %s1228_s23 }
 0x2b1   : > { %p1433_p9 = pnand %p1439_p7, %p1769_p8 }
 0x2b3   : > { %1644 = dma.done.wait (!%p1433_p9), %s1229_s16, 2048  }
 0x2b4   : > { %1646 = vsyncadd (!%p1433_p9), %s1229_s16, 4294965248  ;;  %s1238_s11 = scalar_lea.sflag [#allocation6], %s1228_s23 }
 0x2b5   : > { %1648 = dma.done.wait (!%p1433_p9), %s1238_s11, 1024  }
 0x2b6   : > { %1650 = vsyncadd (!%p1433_p9), %s1238_s11, 4294966272  ;;  %s24_s29 = sadd.s32 1, %s1673_s29   ;;  %s2099_s24 = smov %s1657_s25 }
 0x2b7   : > { %p21_p10 = scmp.ge.s32.totalorder %s24_s29, 4   ;;  %s2100_s25 = smov %s1661_s26 }
 0x2b8   : > { %s2101_s26 = smov %s1775_s14  ;;  %s2102_s27 = smov %s1669_s28 }
 0x2b9   : > { %s2103_s28 = smov %s2105_s9  ;;  %23 = sbr.rel (!%p21_p10) target bundleno = 6 (0x6), region = 100 }
 0x2c0   :  { %1243 = vsyncpa [#allocation4], 1 }
 0x2c1   :  { %1245 = vsyncpa [#allocation4 + $0x1], 1 }
 0x2c2   :  { %1246 = vsyncpa [#allocation6], 1 }
 0x2c3   :  { %1248 = vsyncpa [#allocation6 + $0x1], 1 }

</bundles_post_ra>
